<compile_context>
chip_gen: v5e
topology: v5e:2x2
jax: 0.10.0
libtpu: 0.0.40
codegen_flags: <defaults>
</compile_context>

<pallas_src>
import jax
import jax.numpy as jnp
from jax import lax
from jax.experimental import pallas as pl
from jax.experimental.pallas import tpu as pltpu

LRELU_SLOPE = 0.2
COMPUTE_DTYPE = jnp.bfloat16     # MXU operand dtype (accumulation stays f32)
ACT_DTYPE = jnp.bfloat16         # inter-layer activation dtype in HBM


def _round_up(x, m):
    return ((x + m - 1) // m) * m


def _phys_bytes(shape, itemsize):
    """Physical VMEM bytes: lane dim rounded to 128, sublane dim to 8 (32-bit) / 16 (16-bit)."""
    shape = tuple(int(s) for s in shape)
    if len(shape) == 0:
        return 8 * 128 * itemsize
    if len(shape) == 1:
        lead, sub, lane = 1, 1, shape[0]
    else:
        lead = 1
        for d in shape[:-2]:
            lead *= d
        sub, lane = shape[-2], shape[-1]
    sub_mult = 8 if itemsize >= 4 else 16
    return lead * _round_up(max(sub, 1), sub_mult) * _round_up(max(lane, 1), 128) * itemsize


def _vmem_capacity_bytes():
    try:
        info = pltpu.get_tpu_info()
        cap = int(getattr(info, "vmem_capacity_bytes", 0))
        if cap > 0:
            return cap
    except Exception:
        pass
    return 64 * 1024 * 1024          # conservative fallback (v7x per-core VMEM)


_VMEM_CAP = _vmem_capacity_bytes()
_VMEM_LIMIT_BYTES = max((_VMEM_CAP * 3) // 4, 32 * 1024 * 1024)   # 48 MiB v7x, 96 MiB v5e/v6e
_VMEM_BUDGET = max(_VMEM_LIMIT_BYTES - (6 << 20), 12 << 20)        # per-grid-step footprint cap


def _min_grid_steps(N):
    if N >= 4:
        return 4          # >=2 steps per TensorCore on v7x, pipelining everywhere
    if N >= 2:
        return 2
    return 1


def _choose_tn(N, footprint_fn):
    """Largest divisor of N that fits the VMEM budget and keeps the grid >= min steps."""
    best = 1
    max_tn = max(1, N // _min_grid_steps(N))
    for cand in range(1, max_tn + 1):
        if N % cand:
            continue
        if footprint_fn(cand) <= _VMEM_BUDGET:
            best = cand
    return best


def _make_kernel(*, K, S, pad, H, H_out, Hp, TN, C_in, Cpad, C_out, lrelu, post=None):
    copy_rows = min(H, Hp - pad)
    tail = Hp - pad - copy_rows
    M = TN * H_out
    KC = K * Cpad

    def tap(ref, k, stride, rows):
        if stride == 1:
            return ref[:, pl.ds(k, rows), :]
        return ref[:, pl.ds(k, rows, stride=stride), :]

    def fill_xpad(x_ref, xpad_ref):
        cpx = Cpad if C_in > 1 else 1
        if cpx > C_in:
            # Channel-padded layer (C_in=64): zero everything once (small layer), then copy.
            xpad_ref[...] = jnp.zeros((TN, Hp, cpx), jnp.float32)
        else:
            if pad > 0:
                xpad_ref[:, :pad, :] = jnp.zeros((TN, pad, cpx), jnp.float32)
            if tail > 0:
                xpad_ref[:, pad + copy_rows:, :] = jnp.zeros((TN, tail, cpx), jnp.float32)
        xpad_ref[:, pad:pad + copy_rows, :C_in] = x_ref[:, :copy_rows, :].astype(jnp.float32)

    def main_conv(x_ref, w_ref, b_ref, xpad_ref, im2col_ref):
        fill_xpad(x_ref, xpad_ref)
        if C_in == 1:
            # Contraction depth of 1 would waste the MXU: VPU broadcast-MAC, summed in vregs.
            y = None
            for k in range(K):
                xs = tap(xpad_ref, k, S, H_out)                       # (TN, H_out, 1) f32
                wk = w_ref[k].astype(jnp.float32)                     # (1, C_out)
                t = xs * wk
                y = t if y is None else y + t
            y = y + b_ref[...].astype(jnp.float32)
            if lrelu:
                y = jnp.where(y > 0, y, LRELU_SLOPE * y)
            return y                                                  # (TN, H_out, C_out) f32
        # im2col build: one lane-aligned column block per tap, then a single MXU call with
        # contraction depth K*Cpad (replaces K dots + f32 accumulator round trips).
        for k in range(K):
            xs = tap(xpad_ref, k, S, H_out)                           # (TN, H_out, Cpad) f32
            im2col_ref[:, k * Cpad:(k + 1) * Cpad] = (
                xs.reshape(M, Cpad).astype(COMPUTE_DTYPE))
        y = jnp.dot(im2col_ref[...], w_ref[...],
                    preferred_element_type=jnp.float32)               # (M, C_out) f32
        y = y + b_ref[...].astype(jnp.float32)
        if lrelu:
            y = jnp.where(y > 0, y, LRELU_SLOPE * y)
        return y.reshape(TN, H_out, C_out)

    def unpack_scratch(scratch):
        xpad_ref = scratch[0]
        idx = 1
        im2col_ref = None
        if C_in > 1:
            im2col_ref = scratch[idx]
            idx += 1
        ypad_ref = scratch[idx] if post is not None else None
        return xpad_ref, im2col_ref, ypad_ref

    if post is None:
        def kernel(x_ref, w_ref, b_ref, o_ref, *scratch):
            xpad_ref, im2col_ref, _ = unpack_scratch(scratch)
            y = main_conv(x_ref, w_ref, b_ref, xpad_ref, im2col_ref)
            o_ref[...] = y.astype(o_ref.dtype)
        return kernel

    Kp, padp, Cp_out = post["K"], post["pad"], post["C_out"]

    def kernel(x_ref, w_ref, b_ref, wp_ref, bp_ref, o_ref, op_ref, *scratch):
        xpad_ref, im2col_ref, ypad_ref = unpack_scratch(scratch)
        y = main_conv(x_ref, w_ref, b_ref, xpad_ref, im2col_ref)      # (TN, H_out, C_out) f32
        o_ref[...] = y.astype(o_ref.dtype)
        # conv_post fused as an epilogue while y is still on-chip (no HBM round trip of
        # the widest activation).  Output width is 1, so the 3-tap accumulation fits vregs.
        if padp > 0:
            ypad_ref[:, :padp, :] = jnp.zeros((TN, padp, C_out), jnp.float32)
            ypad_ref[:, padp + H_out:, :] = jnp.zeros((TN, padp, C_out), jnp.float32)
        ypad_ref[:, padp:padp + H_out, :] = y
        accp = None
        for k in range(Kp):
            xs = tap(ypad_ref, k, 1, H_out).reshape(M, C_out).astype(COMPUTE_DTYPE)
            c = jnp.dot(xs, wp_ref[k], preferred_element_type=jnp.float32)   # (M, Cp_out)
            accp = c if accp is None else accp + c
        yp = accp + bp_ref[...].astype(jnp.float32)
        op_ref[...] = yp.reshape(TN, H_out, Cp_out).astype(op_ref.dtype)

    return kernel


def conv_block_pallas(x, layer, post=None):
    """x: (N, H, C_in) bf16.  `layer` / `post` are dicts from prepare_params.
    Returns the (N, H_out, C_out) bf16 conv output; with `post`, also the fused
    conv_post output (N, H_out, Cp_out) bf16."""
    N, H, C_in = x.shape
    K, S, pad = layer["K"], layer["S"], layer["pad"]
    C_out, Cpad, lrelu = layer["C_out"], layer["Cpad"], layer["lrelu"]
    w, b = layer["w"], layer["b"]
    assert C_in == layer["C_in"]

    H_out = (H + 2 * pad - K) // S + 1
    assert H_out >= 1, "input too short for this conv"
    Hp = (H_out - 1) * S + K             # padded rows actually read by the taps

    fused = post is not None
    if fused:
        Kp, padp, Cp_out = post["K"], post["pad"], post["C_out"]
        assert post["C_in"] == C_out and post["Cpad"] == C_out
        wp3 = post["w"].reshape(Kp, C_out, Cp_out)
        bp = post["b"]

    def footprint(tn):
        bf, f32 = 2, 4
        m = tn * H_out
        total = 0
        total += 2 * _phys_bytes((tn, H, C_in), bf)            # input block (double-buffered)
        total += 2 * _phys_bytes((tn, H_out, C_out), bf)       # output block (double-buffered)
        total += _phys_bytes((tn, Hp, Cpad if C_in > 1 else 1), f32)     # xpad scratch
        if C_in > 1:
            total += _phys_bytes((m, K * Cpad), bf)            # im2col scratch
        total += _phys_bytes((m, C_out), f32)                  # matmul-result staging
        total += _phys_bytes((m, Cpad), f32)                   # tap-load transient (slack)
        total += 2 * (_phys_bytes(w.shape, bf) + _phys_bytes(b.shape, f32))   # weights x2 bufs
        if fused:
            total += 2 * _phys_bytes((tn, H_out, Cp_out), bf)              # post output block
            total += _phys_bytes((tn, H_out + 2 * padp, C_out), f32)       # ypad scratch
            total += _phys_bytes((m, C_out), bf)                           # post tap transient
            total += 2 * (_phys_bytes(wp3.shape, bf) + _phys_bytes(bp.shape, f32))
        return total

    TN = _choose_tn(N, footprint)
    grid = (N // TN,)

    if w.ndim == 3:
        w_spec = pl.BlockSpec(w.shape, lambda i: (0, 0, 0))
    else:
        w_spec = pl.BlockSpec(w.shape, lambda i: (0, 0))
    in_specs = [
        pl.BlockSpec((TN, H, C_in), lambda i: (i, 0, 0)),
        w_spec,
        pl.BlockSpec(b.shape, lambda i: (0, 0)),
    ]
    operands = [x, w, b]
    scratch = [pltpu.VMEM((TN, Hp, Cpad if C_in > 1 else 1), jnp.float32)]
    if C_in > 1:
        scratch.append(pltpu.VMEM((TN * H_out, K * Cpad), COMPUTE_DTYPE))

    if not fused:
        out_shape = jax.ShapeDtypeStruct((N, H_out, C_out), ACT_DTYPE)
        out_specs = pl.BlockSpec((TN, H_out, C_out), lambda i: (i, 0, 0))
        kernel = _make_kernel(K=K, S=S, pad=pad, H=H, H_out=H_out, Hp=Hp, TN=TN,
                              C_in=C_in, Cpad=Cpad, C_out=C_out, lrelu=lrelu)
    else:
        in_specs += [
            pl.BlockSpec(wp3.shape, lambda i: (0, 0, 0)),
            pl.BlockSpec(bp.shape, lambda i: (0, 0)),
        ]
        operands += [wp3, bp]
        out_shape = (jax.ShapeDtypeStruct((N, H_out, C_out), ACT_DTYPE),
                     jax.ShapeDtypeStruct((N, H_out, Cp_out), ACT_DTYPE))
        out_specs = (pl.BlockSpec((TN, H_out, C_out), lambda i: (i, 0, 0)),
                     pl.BlockSpec((TN, H_out, Cp_out), lambda i: (i, 0, 0)))
        scratch.append(pltpu.VMEM((TN, H_out + 2 * padp, C_out), jnp.float32))
        kernel = _make_kernel(K=K, S=S, pad=pad, H=H, H_out=H_out, Hp=Hp, TN=TN,
                              C_in=C_in, Cpad=Cpad, C_out=C_out, lrelu=lrelu,
                              post=dict(K=Kp, pad=padp, C_out=Cp_out))

    return pl.pallas_call(
        kernel,
        out_shape=out_shape,
        grid=grid,
        in_specs=in_specs,
        out_specs=out_specs,
        scratch_shapes=scratch,
        compiler_params=pltpu.CompilerParams(
            dimension_semantics=("parallel",),   # N tiles independent (2 TCs on v7x)
            vmem_limit_bytes=_VMEM_LIMIT_BYTES),
    )(*operands)


def prepare_params(params):
    """Hoisted weight re-layout (out of the forward):
    OIHW f32 -> im2col layout (K*Cpad, C_out) bf16 (C_in zero-padded to a multiple of 128
    so every tap's column block is lane-aligned); bias -> (1, C_out) f32.
    weight_norm effective weight assumed equal to raw weight (true at init)."""
    prepped = []
    for (w_oihw, bias, K, S, pad, lrelu) in params:
        C_out, C_in = int(w_oihw.shape[0]), int(w_oihw.shape[1])
        w_kio = jnp.transpose(w_oihw[:, :, :, 0], (2, 1, 0))       # (K, C_in, C_out)
        if C_in == 1:
            w_prep = w_kio.astype(COMPUTE_DTYPE)                    # (K, 1, C_out), VPU path
            Cpad = 1
        else:
            Cpad = _round_up(C_in, 128)
            if Cpad != C_in:
                w_kio = jnp.pad(w_kio, ((0, 0), (0, Cpad - C_in), (0, 0)))
            w_prep = w_kio.reshape(K * Cpad, C_out).astype(COMPUTE_DTYPE)
        prepped.append(dict(w=w_prep, b=bias.reshape(1, -1).astype(jnp.float32),
                            K=K, S=S, pad=pad, lrelu=lrelu,
                            C_in=C_in, C_out=C_out, Cpad=Cpad))
    return prepped


def discriminator_p_forward(x, prepped, period):
    """x: (B, 1, T) f32; prepped from prepare_params.
    Returns (fmap list of NCHW f32 arrays, flattened last output) like the torch module."""
    B, C, T = x.shape
    if T % period != 0:
        n_pad = period - T % period
        x = jnp.pad(x, ((0, 0), (0, 0), (0, n_pad)), mode="reflect")
        T = T + n_pad
    W = period
    H = T // period
    # Fold the period axis into batch; channels go on lanes.  bf16 activations in HBM.
    h = jnp.transpose(x.reshape(B, C, H, W), (0, 3, 2, 1)).reshape(B * W, H, C)
    h = h.astype(ACT_DTYPE)

    fmap = []
    n_layers = len(prepped)
    i = 0
    while i < n_layers:
        layer = prepped[i]
        post = None
        if i == n_layers - 2:
            nxt = prepped[i + 1]
            if (nxt["S"] == 1 and nxt["K"] == 2 * nxt["pad"] + 1
                    and not nxt["lrelu"] and nxt["C_in"] == layer["C_out"]):
                post = nxt                       # fuse conv_post into the last conv
        if post is None:
            outs = (conv_block_pallas(h, layer),)
            i += 1
        else:
            outs = conv_block_pallas(h, layer, post=post)
            i += 2
        for o in outs:
            Hc, Cc = o.shape[1], o.shape[2]
            # NCHW f32 fmap entries (torch layout); the conv chain itself stays (N,H,C) bf16.
            fmap.append(jnp.transpose(o.reshape(B, W, Hc, Cc), (0, 3, 2, 1))
                        .astype(jnp.float32))
        h = outs[0]

    x_flat = fmap[-1].reshape(B, -1)             # torch.flatten(x, 1, -1)
    return fmap, x_flat


def ref_forward(x, params, period, compute_dtype=jnp.float32):
    """Pure-JAX reference (lax.conv).  compute_dtype=bf16 mirrors the kernel numerics,
    including the bf16 rounding of inter-layer activations stored in HBM."""
    B, C, T = x.shape
    if T % period != 0:
        n_pad = period - T % period
        x = jnp.pad(x, ((0, 0), (0, 0), (0, n_pad)), mode="reflect")
        T = T + n_pad
    h = x.reshape(B, C, T // period, period)
    mirror = compute_dtype != jnp.float32
    fmap = []
    for (w, bias, K, S, pad, lrelu) in params:
        h = lax.conv_general_dilated(
            h.astype(compute_dtype), w.astype(compute_dtype),
            window_strides=(S, 1), padding=((pad, pad), (0, 0)),
            dimension_numbers=("NCHW", "OIHW", "NCHW"),
            preferred_element_type=jnp.float32)
        h = h + bias.reshape(1, -1, 1, 1)
        if lrelu:
            h = jnp.where(h > 0, h, LRELU_SLOPE * h)
        if mirror:
            h = h.astype(compute_dtype).astype(jnp.float32)   # kernel stores bf16 activations
        fmap.append(h)
    return fmap, h.reshape(B, -1)


if __name__ == "__main__":
    key = jax.random.PRNGKey(0)
    period = 4
    B, Cin, T = 2, 1, 50          # (b, c, t) as in the module's forward

    # (C_in, C_out, K, S, pad, leaky_relu_after)
    configs = [
        (1, 64, 5, 3, 2, True),
        (64, 128, 5, 3, 2, True),
        (128, 256, 5, 3, 2, True),
        (256, 512, 5, 3, 2, True),
        (512, 1024, 5, 1, 2, True),
        (1024, 1, 3, 1, 1, False),   # conv_post
    ]

    params = []
    for (ci, co, K, S, pad, lrelu) in configs:
        key, kw, kb = jax.random.split(key, 3)
        w = jax.random.normal(kw, (co, ci, K, 1), jnp.float32) / jnp.sqrt(ci * K)
        bia = jax.random.normal(kb, (co,), jnp.float32) * 0.01
        params.append((w, bia, K, S, pad, lrelu))

    key, kx = jax.random.split(key)
    x = jax.random.normal(kx, (B, Cin, T), jnp.float32)

    prepped = prepare_params(params)
    fmap, flat = discriminator_p_forward(x, prepped, period)
    jax.block_until_ready(flat)

    # Reference mirroring the kernel precision (bf16 operands + bf16 stored activations)
    fmap_bf, flat_bf = ref_forward(x, params, period, compute_dtype=jnp.bfloat16)
    # Pure f32 spec reference (loose tolerance: kernel uses bf16 MXU operands/activations)
    fmap_f32, flat_f32 = ref_forward(x, params, period, compute_dtype=jnp.float32)

    for a, r, rf in zip(fmap, fmap_bf, fmap_f32):
        assert a.shape == r.shape, (a.shape, r.shape)
        assert float(jnp.max(jnp.abs(a - r))) < 2e-2
        loose = 1.5e-1 * (1.0 + float(jnp.max(jnp.abs(rf))))
        assert float(jnp.max(jnp.abs(a - rf))) < loose
    assert flat.shape == flat_bf.shape
    assert float(jnp.max(jnp.abs(flat - flat_bf))) < 2e-2

    print("KERNEL_OK")
</pallas_src>

<mosaic_0001>
module attributes {stable_mosaic.version = 11 : i64} {
  func.func @kernel(%arg0: i32, %arg1: memref<2x13x1xbf16, #tpu.memory_space<vmem>>, %arg2: memref<5x1x64xbf16, #tpu.memory_space<vmem>>, %arg3: memref<1x64xf32, #tpu.memory_space<vmem>>, %arg4: memref<2x5x64xbf16, #tpu.memory_space<vmem>>, %arg5: memref<2x17x1xf32, #tpu.memory_space<vmem>>) attributes {dimension_semantics = [#tpu.dimension_semantics<parallel>], iteration_bounds = array<i64: 4>, scalar_prefetch = 0 : i64, scratch_operands = 1 : i64, tpu.core_type = #tpu.core_type<tc>, window_params = [{transform_indices = @transform_0, window_bounds = array<i64: 2, 13, 1>}, {pipeline_mode = #tpu.pipeline_mode<synchronous>, transform_indices = @transform_1, window_bounds = array<i64: 5, 1, 64>}, {pipeline_mode = #tpu.pipeline_mode<synchronous>, transform_indices = @transform_2, window_bounds = array<i64: 1, 64>}, {transform_indices = @transform_3, window_bounds = array<i64: 2, 5, 64>}]} {
    %cst = arith.constant 0.000000e+00 : f32
    %0 = vector.broadcast %cst : f32 to vector<2x2x1xf32>
    %c0 = arith.constant 0 : index
    %c0_0 = arith.constant 0 : index
    %c0_1 = arith.constant 0 : index
    %1 = vector.load %arg5[%c0, %c0_0, %c0_1] : memref<2x17x1xf32, #tpu.memory_space<vmem>>, vector<2x2x1xf32>
    tpu.vector_store %arg5[%c0, %c0_0, %c0_1], %0 {strides = array<i32>} : memref<2x17x1xf32, #tpu.memory_space<vmem>>, vector<2x2x1xf32>,
    %cst_2 = arith.constant 0.000000e+00 : f32
    %2 = vector.broadcast %cst_2 : f32 to vector<2x2x1xf32>
    %c0_3 = arith.constant 0 : index
    %c15 = arith.constant 15 : index
    %c0_4 = arith.constant 0 : index
    %3 = vector.load %arg5[%c0_3, %c15, %c0_4] : memref<2x17x1xf32, #tpu.memory_space<vmem>>, vector<2x2x1xf32>
    tpu.vector_store %arg5[%c0_3, %c15, %c0_4], %2 {strides = array<i32>} : memref<2x17x1xf32, #tpu.memory_space<vmem>>, vector<2x2x1xf32>,
    %c0_5 = arith.constant 0 : index
    %c0_6 = arith.constant 0 : index
    %c0_7 = arith.constant 0 : index
    %4 = vector.load %arg1[%c0_5, %c0_6, %c0_7] : memref<2x13x1xbf16, #tpu.memory_space<vmem>>, vector<2x13x1xbf16>
    %5 = arith.extf %4 : vector<2x13x1xbf16> to vector<2x13x1xf32>
    %c0_8 = arith.constant 0 : index
    %c2 = arith.constant 2 : index
    %c0_9 = arith.constant 0 : index
    %6 = vector.load %arg5[%c0_8, %c2, %c0_9] : memref<2x17x1xf32, #tpu.memory_space<vmem>>, vector<2x13x1xf32>
    tpu.vector_store %arg5[%c0_8, %c2, %c0_9], %5 {strides = array<i32>} : memref<2x17x1xf32, #tpu.memory_space<vmem>>, vector<2x13x1xf32>,
    %c0_10 = arith.constant 0 : index
    %c0_11 = arith.constant 0 : index
    %c0_12 = arith.constant 0 : index
    %7 = tpu.strided_load %arg5[%c0_10, %c0_11, %c0_12] {strides = array<i32: 1, 3, 1>} : memref<2x17x1xf32, #tpu.memory_space<vmem>>, vector<2x5x1xf32>
    %c0_13 = arith.constant 0 : index
    %c0_14 = arith.constant 0 : index
    %c0_15 = arith.constant 0 : index
    %8 = vector.load %arg2[%c0_13, %c0_14, %c0_15] : memref<5x1x64xbf16, #tpu.memory_space<vmem>>, vector<1x1x64xbf16>
    %9 = vector.shape_cast %8 : vector<1x1x64xbf16> to vector<1x64xbf16>
    %10 = arith.extf %9 : vector<1x64xbf16> to vector<1x64xf32>
    %11 = vector.shape_cast %10 : vector<1x64xf32> to vector<1x1x64xf32>
    %12 = vector.broadcast %7 : vector<2x5x1xf32> to vector<2x5x64xf32>
    %13 = vector.broadcast %11 : vector<1x1x64xf32> to vector<2x5x64xf32>
    %14 = arith.mulf %12, %13 : vector<2x5x64xf32>
    %c0_16 = arith.constant 0 : index
    %c1 = arith.constant 1 : index
    %c0_17 = arith.constant 0 : index
    %15 = tpu.strided_load %arg5[%c0_16, %c1, %c0_17] {strides = array<i32: 1, 3, 1>} : memref<2x17x1xf32, #tpu.memory_space<vmem>>, vector<2x5x1xf32>
    %c1_18 = arith.constant 1 : index
    %c0_19 = arith.constant 0 : index
    %c0_20 = arith.constant 0 : index
    %16 = vector.load %arg2[%c1_18, %c0_19, %c0_20] : memref<5x1x64xbf16, #tpu.memory_space<vmem>>, vector<1x1x64xbf16>
    %17 = vector.shape_cast %16 : vector<1x1x64xbf16> to vector<1x64xbf16>
    %18 = arith.extf %17 : vector<1x64xbf16> to vector<1x64xf32>
    %19 = vector.shape_cast %18 : vector<1x64xf32> to vector<1x1x64xf32>
    %20 = vector.broadcast %15 : vector<2x5x1xf32> to vector<2x5x64xf32>
    %21 = vector.broadcast %19 : vector<1x1x64xf32> to vector<2x5x64xf32>
    %22 = arith.mulf %20, %21 : vector<2x5x64xf32>
    %23 = arith.addf %14, %22 : vector<2x5x64xf32>
    %c0_21 = arith.constant 0 : index
    %c2_22 = arith.constant 2 : index
    %c0_23 = arith.constant 0 : index
    %24 = tpu.strided_load %arg5[%c0_21, %c2_22, %c0_23] {strides = array<i32: 1, 3, 1>} : memref<2x17x1xf32, #tpu.memory_space<vmem>>, vector<2x5x1xf32>
    %c2_24 = arith.constant 2 : index
    %c0_25 = arith.constant 0 : index
    %c0_26 = arith.constant 0 : index
    %25 = vector.load %arg2[%c2_24, %c0_25, %c0_26] : memref<5x1x64xbf16, #tpu.memory_space<vmem>>, vector<1x1x64xbf16>
    %26 = vector.shape_cast %25 : vector<1x1x64xbf16> to vector<1x64xbf16>
    %27 = arith.extf %26 : vector<1x64xbf16> to vector<1x64xf32>
    %28 = vector.shape_cast %27 : vector<1x64xf32> to vector<1x1x64xf32>
    %29 = vector.broadcast %24 : vector<2x5x1xf32> to vector<2x5x64xf32>
    %30 = vector.broadcast %28 : vector<1x1x64xf32> to vector<2x5x64xf32>
    %31 = arith.mulf %29, %30 : vector<2x5x64xf32>
    %32 = arith.addf %23, %31 : vector<2x5x64xf32>
    %c0_27 = arith.constant 0 : index
    %c3 = arith.constant 3 : index
    %c0_28 = arith.constant 0 : index
    %33 = tpu.strided_load %arg5[%c0_27, %c3, %c0_28] {strides = array<i32: 1, 3, 1>} : memref<2x17x1xf32, #tpu.memory_space<vmem>>, vector<2x5x1xf32>
    %c3_29 = arith.constant 3 : index
    %c0_30 = arith.constant 0 : index
    %c0_31 = arith.constant 0 : index
    %34 = vector.load %arg2[%c3_29, %c0_30, %c0_31] : memref<5x1x64xbf16, #tpu.memory_space<vmem>>, vector<1x1x64xbf16>
    %35 = vector.shape_cast %34 : vector<1x1x64xbf16> to vector<1x64xbf16>
    %36 = arith.extf %35 : vector<1x64xbf16> to vector<1x64xf32>
    %37 = vector.shape_cast %36 : vector<1x64xf32> to vector<1x1x64xf32>
    %38 = vector.broadcast %33 : vector<2x5x1xf32> to vector<2x5x64xf32>
    %39 = vector.broadcast %37 : vector<1x1x64xf32> to vector<2x5x64xf32>
    %40 = arith.mulf %38, %39 : vector<2x5x64xf32>
    %41 = arith.addf %32, %40 : vector<2x5x64xf32>
    %c0_32 = arith.constant 0 : index
    %c4 = arith.constant 4 : index
    %c0_33 = arith.constant 0 : index
    %42 = tpu.strided_load %arg5[%c0_32, %c4, %c0_33] {strides = array<i32: 1, 3, 1>} : memref<2x17x1xf32, #tpu.memory_space<vmem>>, vector<2x5x1xf32>
    %c4_34 = arith.constant 4 : index
    %c0_35 = arith.constant 0 : index
    %c0_36 = arith.constant 0 : index
    %43 = vector.load %arg2[%c4_34, %c0_35, %c0_36] : memref<5x1x64xbf16, #tpu.memory_space<vmem>>, vector<1x1x64xbf16>
    %44 = vector.shape_cast %43 : vector<1x1x64xbf16> to vector<1x64xbf16>
    %45 = arith.extf %44 : vector<1x64xbf16> to vector<1x64xf32>
    %46 = vector.shape_cast %45 : vector<1x64xf32> to vector<1x1x64xf32>
    %47 = vector.broadcast %42 : vector<2x5x1xf32> to vector<2x5x64xf32>
    %48 = vector.broadcast %46 : vector<1x1x64xf32> to vector<2x5x64xf32>
    %49 = arith.mulf %47, %48 : vector<2x5x64xf32>
    %50 = arith.addf %41, %49 : vector<2x5x64xf32>
    %c0_37 = arith.constant 0 : index
    %c0_38 = arith.constant 0 : index
    %51 = vector.load %arg3[%c0_37, %c0_38] : memref<1x64xf32, #tpu.memory_space<vmem>>, vector<1x64xf32>
    %52 = vector.shape_cast %51 : vector<1x64xf32> to vector<1x1x64xf32>
    %53 = vector.broadcast %52 : vector<1x1x64xf32> to vector<2x5x64xf32>
    %54 = arith.addf %50, %53 : vector<2x5x64xf32>
    %cst_39 = arith.constant 0.000000e+00 : f32
    %55 = vector.broadcast %cst_39 : f32 to vector<2x5x64xf32>
    %56 = arith.cmpf ogt, %54, %55 : vector<2x5x64xf32>
    %cst_40 = arith.constant 2.000000e-01 : f32
    %57 = vector.broadcast %cst_40 : f32 to vector<2x5x64xf32>
    %58 = arith.mulf %57, %54 : vector<2x5x64xf32>
    %59 = arith.select %56, %54, %58 : vector<2x5x64xi1>, vector<2x5x64xf32>
    %60 = arith.truncf %59 : vector<2x5x64xf32> to vector<2x5x64xbf16>
    %c0_41 = arith.constant 0 : index
    %c0_42 = arith.constant 0 : index
    %c0_43 = arith.constant 0 : index
    %61 = vector.load %arg4[%c0_41, %c0_42, %c0_43] : memref<2x5x64xbf16, #tpu.memory_space<vmem>>, vector<2x5x64xbf16>
    tpu.vector_store %arg4[%c0_41, %c0_42, %c0_43], %60 {strides = array<i32>} : memref<2x5x64xbf16, #tpu.memory_space<vmem>>, vector<2x5x64xbf16>,
    return
  }
  func.func @transform_0(%arg0: i32) -> (i32, i32, i32) {
    %c0_i32 = arith.constant 0 : i32
    %c0_i32_0 = arith.constant 0 : i32
    %c0_i32_1 = arith.constant 0 : i32
    return %arg0, %c0_i32, %c0_i32_0 : i32, i32, i32
  }
  func.func @transform_1(%arg0: i32) -> (i32, i32, i32) {
    %c0_i32 = arith.constant 0 : i32
    %c0_i32_0 = arith.constant 0 : i32
    %c0_i32_1 = arith.constant 0 : i32
    %c0_i32_2 = arith.constant 0 : i32
    return %c0_i32, %c0_i32_0, %c0_i32_1 : i32, i32, i32
  }
  func.func @transform_2(%arg0: i32) -> (i32, i32) {
    %c0_i32 = arith.constant 0 : i32
    %c0_i32_0 = arith.constant 0 : i32
    %c0_i32_1 = arith.constant 0 : i32
    return %c0_i32, %c0_i32_0 : i32, i32
  }
  func.func @transform_3(%arg0: i32) -> (i32, i32, i32) {
    %c0_i32 = arith.constant 0 : i32
    %c0_i32_0 = arith.constant 0 : i32
    %c0_i32_1 = arith.constant 0 : i32
    return %arg0, %c0_i32, %c0_i32_0 : i32, i32, i32
  }
}

</mosaic_0001>

<bundles_post_ra>
// kernel: tpu_custom_call.1
= control target key start
LH: loop header
LB: loop body
LE: loop exit
PB: predicated region body
PF: predicated region fallthrough
CT: control target
= control target key end

     0   :  { %s442_s12 = smov 0   ;;  %s481_s0 = inlined_call_operand.vmem [shape: bf16[8,13,1], index: 0, kind: input, shape index: {}]   ;;  %s482_s1 = inlined_call_operand.vmem [shape: bf16[5,1,64], index: 1, kind: input, shape index: {}]   ;;  %s483_s2 = inlined_call_operand.vmem [shape: f32[1,64], index: 2, kind: input, shape index: {}]   ;;  %s484_s3 = inlined_call_operand.vmem [shape: bf16[8,5,64], index: 3, kind: output, shape index: {}]  }
   0x1 LB: > { %s381_s13 = sadd.s32 4294967295, %s418_s12   ;;  %p385_p0 = scmp.ge.s32.totalorder %s418_s12, 1  ;;  %s418_s12 = sphi %s442_s12, %s13_s12  }
   0x2   : > { %p139_p1 = scmp.lt.s32.totalorder %s418_s12, 5 }
   0x4   : > { %p140_p2 = pnand %p385_p0, %p139_p1 }
   0x5   : > { %s386_s14 = sshll.u32 (!%p140_p2), %s381_s13, 1 }
   0x6   : > { %143 = sbr.rel (%p140_p2) target bundleno = 178 (0xb2), region = 32  ;;  %p165_p3 = scmp.lt.s32.totalorder (!%p140_p2), %s386_s14, 7 }
   0xb   : > { %vm177_vm0 = vcmask 1024   ;;  %v420_v0 = vmov 0   ;;  %v421_v1 = vmov 0.0   ;;  %s486_s14 = smov (!%p165_p3, %s386_s14), 7  ;;  %vm190_vm1 = vcmask 7168  }
   0xc   : > { %409 = vset.pattern.permute.xlu1 %v420_v0  ;;  %408 = vset.pattern.permute.xlu0 %v420_v0  ;;  %178 = vst.msk [vmem:[#allocation2] sm:$0x3] %vm177_vm0, %v421_v1  ;;  %s397_s15 = sshll.u32 %s486_s14, 3  ;;  %vm192_vm2 = vcmask 4096   ;;  %v199_v20 = vld [vmem:[%s482_s1] sm:$0x1] }
   0xd   : > { %410 = vset.pattern.permute.xlu2 %v420_v0  ;;  %179 = vst.msk [vmem:[#allocation2 + $0x18] sm:$0x3] %vm177_vm0, %v421_v1  ;;  %s169_s18 = scalar_lea.vmem %s481_s0, %s397_s15  ;;  %v391_v21 = vld [vmem:[%s482_s1 + $0x1] sm:$0x1]  ;;  %v392_v23 = vld [vmem:[%s482_s1 + $0x2] sm:$0x1]  ;;  %v200_v26 = vunpack.c.l.bf16 %v199_v20 }
   0xe   : > { %180 = vst.msk [vmem:[#allocation2 + $0xf] sm:$0x3] %vm177_vm0, %v421_v1  ;;  %v182_v2 = vld [vmem:[%s169_s18] sm:$0xf]  ;;  %v183_v3 = vld [vmem:[%s169_s18 + $0x4] sm:$0x7]  ;;  %v220_v27 = vunpack.c.l.bf16 %v391_v21  ;;  %v242_v28 = vunpack.c.l.bf16 %v392_v23 }
   0xf   : > { %181 = vst.msk [vmem:[#allocation2 + $0x27] sm:$0x3] %vm177_vm0, %v421_v1  ;;  %v184_v4 = vld [vmem:[%s169_s18 + $0x8] sm:$0xf]  ;;  %v186_v5 = vunpack.c.l.bf16 %v182_v2  ;;  %v187_v6 = vunpack.c.l.bf16 %v183_v3  ;;  %v185_v7 = vld [vmem:[%s169_s18 + $0xc] sm:$0x7] }
  0x10   : > { %v188_v8 = vunpack.c.l.bf16 %v184_v4  ;;  %v189_v9 = vunpack.c.l.bf16 %v185_v7  ;;  %v394_v29 = vld [vmem:[%s482_s1 + $0x4] sm:$0x1]  ;;  %v393_v30 = vld [vmem:[%s482_s1 + $0x3] sm:$0x1]  ;;  %v211_v31 = vperm.slane %v200_v26, 0  ;;  %v231_v32 = vperm.slane %v220_v27, 0 }
  0x11   : > { %191 = vst.msk [vmem:[#allocation2 + $0x2] sm:$0xff] %vm190_vm1, %v186_v5  ;;  %v286_v33 = vunpack.c.l.bf16 %v394_v29  ;;  %v253_v34 = vperm.slane %v242_v28, 0  ;;  %v264_v35 = vunpack.c.l.bf16 %v393_v30  ;;  %v411_v49 = vld [vmem:[%s483_s2] ss:$0 sm:$0xff]  ;;  %s390_s4 = sshll.u32 %s486_s14, 2  ;;  %vm316_vm3 = vcmask 518144  }
  0x12   : > { %193 = vst.msk [vmem:[#allocation2 + $0xa] sm:$0x1f] %vm192_vm2, %v187_v6  ;;  %s175_s7 = scalar_lea.vmem %s484_s3, %s390_s4  ;;  %vm317_vm4 = vsmask.f32 2304 }
  0x13   : > { %194 = vst.msk [vmem:[#allocation2 + $0x1a] sm:$0xff] %vm190_vm1, %v188_v8  ;;  %v297_v41 = vperm.slane %v286_v33, 0  ;;  %v275_v43 = vperm.slane %v264_v35, 0  ;;  %vm318_vm6 = vmand %vm316_vm3, %vm317_vm4  ;;  %v319_v63 = vld [vmem:[%s175_s7] sm:$0x7] }
  0x14   : > { %195 = vst.msk [vmem:[#allocation2 + $0x22] sm:$0x1f] %vm192_vm2, %v189_v9  ;;  %v322_v9 = vld [vmem:[%s175_s7 + $0x4] sm:$0x7] }
  0x19   : > { %v237_v10 = vld [vmem:[#allocation2 + $0x2] ss:$3 sm:$0x1f]  ;;  %v196_v11 = vld [vmem:[#allocation2] ss:$3 sm:$0x1f] }
  0x1a   : > { %245 = vperm.xlu1 %409, %v237_v10   ;;  %203 = vperm.xlu0 %408, %v196_v11   ;;  %v281_v12 = vld [vmem:[#allocation2 + $0x4] ss:$3 sm:$0x1f]  ;;  %v259_v13 = vld [vmem:[#allocation2 + $0x3] ss:$3 sm:$0x1f] }
  0x1b   : > { %289 = vperm.xlu2 %410, %v281_v12   ;;  %v215_v14 = vld [vmem:[#allocation2 + $0x1] ss:$3 sm:$0x1f]  ;;  %v239_v16 = vld [vmem:[#allocation2 + $0x1a] ss:$3 sm:$0x1f] }
  0x1c   : > { %v198_v15 = vld [vmem:[#allocation2 + $0x18] ss:$3 sm:$0x1f]  ;;  %v217_v17 = vld [vmem:[#allocation2 + $0x19] ss:$3 sm:$0x1f] }
  0x1d   : > { %v261_v18 = vld [vmem:[#allocation2 + $0x1b] ss:$3 sm:$0x1f]  ;;  %v283_v19 = vld [vmem:[#allocation2 + $0x1c] ss:$3 sm:$0x1f] }
  0x22   : > { %267 = vperm.xlu1 %409, %v259_v13   ;;  %223 = vperm.xlu0 %408, %v215_v14  }
  0x23   : > { %208 = vperm.xlu2 %410, %v198_v15  }
  0x2a   : > { %250 = vperm.xlu1 %409, %v239_v16   ;;  %228 = vperm.xlu0 %408, %v217_v17  }
  0x2b   : > { %272 = vperm.xlu2 %410, %v261_v18  }
  0x32   : > { %294 = vperm.xlu0 %408, %v283_v19  }
  0x75   : > { %v290_v22 = vpop.permute.xlu2 %289 }
  0x76   : > { %v298_v47 = vmul.f32 %v297_v41, %v290_v22 }
  0x7d   : > { %v209_v40 = vpop.permute.xlu2 %208 }
  0x7e   : > { %v213_v52 = vmul.f32 %v211_v31, %v209_v40 }
  0x85   : > { %v273_v58 = vpop.permute.xlu2 %272 }
  0x86   : > { %v277_v61 = vmul.f32 %v275_v43, %v273_v58 }
  0x8c   : > { %v246_v24 = vpop.permute.xlu1 %245  ;;  %v204_v25 = vpop.permute.xlu0 %203 }
  0x8d   : > { %v212_v38 = vmul.f32 %v211_v31, %v204_v25  ;;  %v254_v42 = vmul.f32 %v253_v34, %v246_v24 }
  0x94   : > { %v268_v36 = vpop.permute.xlu1 %267  ;;  %v224_v37 = vpop.permute.xlu0 %223 }
  0x95   : > { %v232_v39 = vmul.f32 %v231_v32, %v224_v37  ;;  %v276_v45 = vmul.f32 %v275_v43, %v268_v36 }
  0x97   : > { %v234_v44 = vadd.f32 %v232_v39, %v212_v38 }
  0x99   : > { %v256_v46 = vadd.f32 %v254_v42, %v234_v44 }
  0x9b   : > { %v278_v48 = vadd.f32 %v276_v45, %v256_v46 }
  0x9c   : > { %v251_v50 = vpop.permute.xlu1 %250  ;;  %v229_v51 = vpop.permute.xlu0 %228 }
  0x9d   : > { %v300_v53 = vadd.f32 %v298_v47, %v278_v48  ;;  %v233_v54 = vmul.f32 %v231_v32, %v229_v51  ;;  %v255_v55 = vmul.f32 %v253_v34, %v251_v50 }
  0x9f   : > { %v235_v56 = vadd.f32 %v233_v54, %v213_v52  ;;  %v306_v57 = vadd.f32 %v411_v49, %v300_v53 }
  0xa1   : > { %v257_v59 = vadd.f32 %v255_v55, %v235_v56  ;;  %vm308_vm5 = vcmp.gt.f32.partialorder %v306_v57, 0.0  ;;  %v310_v60 = vmul.f32 0.2, %v306_v57 }
  0xa3   : > { %v312_v62 = vsel %vm308_vm5, %v306_v57, %v310_v60  ;;  %v279_v2 = vadd.f32 %v277_v61, %v257_v59 }
  0xa4   : > { %v314_v0 = vpack.c.bf16 %v312_v62, %v312_v62  ;;  %v295_v1 = vpop.permute.xlu0 %294 }
  0xa5   : > { %v299_v3 = vmul.f32 %v297_v41, %v295_v1 }
  0xa6   : > { %v320_v4 = vsel %vm318_vm6, %v314_v0, %v319_v63 }
  0xa7   : > { %321 = vst [vmem:[%s175_s7] sm:$0x7] %v320_v4  ;;  %v301_v5 = vadd.f32 %v299_v3, %v279_v2 }
  0xa9   : > { %v307_v6 = vadd.f32 %v411_v49, %v301_v5 }
  0xab   : > { %vm309_vm7 = vcmp.gt.f32.partialorder %v307_v6, 0.0  ;;  %v311_v7 = vmul.f32 0.2, %v307_v6 }
  0xad   : > { %v313_v8 = vsel %vm309_vm7, %v307_v6, %v311_v7 }
  0xae   : > { %v315_v10 = vpack.c.bf16 %v313_v8, %v313_v8 }
  0xb0   : > { %v323_v11 = vsel %vm318_vm6, %v315_v10, %v322_v9 }
  0xb1   : > { %324 = vst [vmem:[%s175_s7 + $0x4] sm:$0x7] %v323_v11 }
  0xb2 PF: > { %s13_s12 = sadd.s32 1, %s418_s12  }
  0xb3   : > { %p10_p4 = scmp.ge.s32.totalorder %s13_s12, 6  }
  0xb5   :  { %12 = sbr.rel (!%p10_p4) target bundleno = 1 (0x1), region = 75 }

</bundles_post_ra>
